<compile_context>
chip_gen: v7x
topology: tpu7x:2x2x1
jax: 0.10.0
libtpu: 0.0.40
codegen_flags: <defaults>
</compile_context>

<pallas_src>
import jax
import jax.numpy as jnp
from jax.experimental import pallas as pl
from jax.experimental.pallas import tpu as pltpu


# ----------------------------- Pallas kernel --------------------------------
def _convfcn_kernel(x_ref, a_ref,
                    w1t_ref, b1_ref,
                    w2at_ref, w2bt_ref, b2_ref,
                    w3t_ref, b3_ref,
                    o_ref):
    # Channel-major tiles: x (L, TP), a (A, TP); pixels on the lane axis.
    x = x_ref[...]                      # bf16 (L, TP)
    a = a_ref[...]                      # bf16 (A, TP)

    # layer 1: (hidden, L) @ (L, TP) -> (hidden, TP), ReLU
    h1 = jnp.dot(w1t_ref[...], x, preferred_element_type=jnp.float32) + b1_ref[...]
    h1 = jnp.maximum(h1, 0.0).astype(jnp.bfloat16)

    # layer 2: concat(h1, a) as split matmul, ReLU
    h2 = (jnp.dot(w2at_ref[...], h1, preferred_element_type=jnp.float32)
          + jnp.dot(w2bt_ref[...], a, preferred_element_type=jnp.float32)
          + b2_ref[...])
    h2 = jnp.maximum(h2, 0.0).astype(jnp.bfloat16)

    # layer 3: (out_dim, hidden) @ (hidden, TP), no activation
    out = jnp.dot(w3t_ref[...], h2, preferred_element_type=jnp.float32) + b3_ref[...]
    o_ref[...] = out.astype(o_ref.dtype)


# ------------------------------ wrapper --------------------------------------
def progressive_encoder_forward(coords, attachedvec, weights, *, tile_pix=2048):
    """coords: (B, L, H, W) NCHW, attachedvec: (B, A, H, W) NCHW -> (B, out_dim, H, W)."""
    w1, b1, w2a, w2b, b2, w3, b3 = weights
    B, L, H, W = coords.shape
    A = attachedvec.shape[1]
    hidden = w1.shape[1]
    out_dim = w3.shape[1]
    HW = H * W

    # base_coding = coords.clone()  -> functional JAX, clone is a no-op.
    # Channel-major: NCHW stays in place, only a free reshape to (B, C, H*W).
    x = coords.reshape(B, L, HW)
    a = attachedvec.reshape(B, A, HW)

    # Lane-dense pixel tile: multiple of 128, no larger than the image.
    tile_pix = max(128, min(tile_pix, HW))
    tile_pix = (tile_pix // 128) * 128
    n_tiles = pl.cdiv(HW, tile_pix)
    HW_pad = n_tiles * tile_pix
    if HW_pad != HW:
        pad = HW_pad - HW
        x = jnp.pad(x, ((0, 0), (0, 0), (0, pad)))
        a = jnp.pad(a, ((0, 0), (0, 0), (0, pad)))

    # Stream activations in bf16 (halves input HBM traffic); accumulate in fp32.
    x = x.astype(jnp.bfloat16)
    a = a.astype(jnp.bfloat16)

    # Tiny resident weights: transpose once for channel-major math, cast bf16.
    w1t = jnp.asarray(w1.T, jnp.bfloat16)            # (hidden, L)
    w2at = jnp.asarray(w2a.T, jnp.bfloat16)          # (hidden, hidden)
    w2bt = jnp.asarray(w2b.T, jnp.bfloat16)          # (hidden, A)
    w3t = jnp.asarray(w3.T, jnp.bfloat16)            # (out_dim, hidden)
    b1c = b1.reshape(hidden, 1).astype(jnp.float32)
    b2c = b2.reshape(hidden, 1).astype(jnp.float32)
    b3c = b3.reshape(out_dim, 1).astype(jnp.float32)

    grid = (B, n_tiles)
    full = lambda bb, pp: (0, 0)   # resident weight/bias blocks

    n_pix = B * HW_pad
    flops = 2 * n_pix * (L * hidden + hidden * hidden + A * hidden + hidden * out_dim)
    bytes_accessed = (n_pix * ((L + A) * 2 + out_dim * 4)
                      + 2 * (L * hidden + hidden * hidden + A * hidden + hidden * out_dim))

    out_flat = pl.pallas_call(
        _convfcn_kernel,
        out_shape=jax.ShapeDtypeStruct((B, out_dim, HW_pad), jnp.float32),
        grid_spec=pltpu.PrefetchScalarGridSpec(
            num_scalar_prefetch=0,
            grid=grid,
            in_specs=[
                pl.BlockSpec((None, L, tile_pix), lambda bb, pp: (bb, 0, pp)),
                pl.BlockSpec((None, A, tile_pix), lambda bb, pp: (bb, 0, pp)),
                pl.BlockSpec(w1t.shape, full),
                pl.BlockSpec(b1c.shape, full),
                pl.BlockSpec(w2at.shape, full),
                pl.BlockSpec(w2bt.shape, full),
                pl.BlockSpec(b2c.shape, full),
                pl.BlockSpec(w3t.shape, full),
                pl.BlockSpec(b3c.shape, full),
            ],
            out_specs=pl.BlockSpec((None, out_dim, tile_pix),
                                   lambda bb, pp: (bb, 0, pp)),
        ),
        compiler_params=pltpu.CompilerParams(
            dimension_semantics=("parallel", "parallel"),
            vmem_limit_bytes=32 * 1024 * 1024),
        cost_estimate=pl.CostEstimate(
            flops=int(flops), transcendentals=0, bytes_accessed=int(bytes_accessed)),
    )(x, a, w1t, b1c, w2at, w2bt, b2c, w3t, b3c)

    if HW_pad != HW:
        out_flat = out_flat[:, :, :HW]
    return out_flat.reshape(B, out_dim, H, W)      # already NCHW


# ------------------------------ utilities ------------------------------------
def init_weights(key, L, A, hidden, out_dim):
    """Deterministic synthetic ConvFcn weights (1x1 convs == dense matrices)."""
    ks = jax.random.split(key, 7)
    s1 = 1.0 / jnp.sqrt(L)
    s2 = 1.0 / jnp.sqrt(hidden + A)
    s3 = 1.0 / jnp.sqrt(hidden)
    w1 = jax.random.uniform(ks[0], (L, hidden), jnp.float32, -s1, s1)
    b1 = jax.random.uniform(ks[1], (hidden,), jnp.float32, -s1, s1)
    w2a = jax.random.uniform(ks[2], (hidden, hidden), jnp.float32, -s2, s2)
    w2b = jax.random.uniform(ks[3], (A, hidden), jnp.float32, -s2, s2)
    b2 = jax.random.uniform(ks[4], (hidden,), jnp.float32, -s2, s2)
    w3 = jax.random.uniform(ks[5], (hidden, out_dim), jnp.float32, -s3, s3)
    b3 = jax.random.uniform(ks[6], (out_dim,), jnp.float32, -s3, s3)
    return (w1, b1, w2a, w2b, b2, w3, b3)


def reference_forward(coords, attachedvec, weights):
    """Pure-JAX reference mirroring the kernel's bf16-in / fp32-accumulate math."""
    w1, b1, w2a, w2b, b2, w3, b3 = weights
    B, L, H, W = coords.shape
    q = lambda t: t.astype(jnp.bfloat16).astype(jnp.float32)
    hp = jax.lax.Precision.HIGHEST
    x = q(coords).transpose(0, 2, 3, 1).reshape(-1, L)
    a = q(attachedvec).transpose(0, 2, 3, 1).reshape(x.shape[0], -1)
    h1 = jax.nn.relu(jnp.dot(x, q(w1), precision=hp) + b1[None, :])
    h2 = jax.nn.relu(jnp.dot(q(h1), q(w2a), precision=hp)
                     + jnp.dot(a, q(w2b), precision=hp) + b2[None, :])
    out = jnp.dot(q(h2), q(w3), precision=hp) + b3[None, :]
    return out.reshape(B, H, W, -1).transpose(0, 3, 1, 2)


if __name__ == "__main__":
    # Small shapes consistent with the module:
    #   params.L = 32 (input channels to ConvFcn), params.out_dim = 28.
    B, H, W = 2, 16, 16
    L, A, hidden, out_dim = 32, 16, 64, 28

    key = jax.random.PRNGKey(0)
    k_c, k_a, k_w = jax.random.split(key, 3)
    coords = jax.random.normal(k_c, (B, L, H, W), jnp.float32)        # NCHW
    attachedvec = jax.random.normal(k_a, (B, A, H, W), jnp.float32)   # NCHW
    weights = init_weights(k_w, L, A, hidden, out_dim)

    out = progressive_encoder_forward(coords, attachedvec, weights)
    out = jax.block_until_ready(out)

    ref = reference_forward(coords, attachedvec, weights)
    assert out.shape == (B, out_dim, H, W)
    max_err = float(jnp.max(jnp.abs(out - ref)))
    assert jnp.allclose(out, ref, atol=5e-3, rtol=5e-3), max_err

    print("KERNEL_OK")
</pallas_src>

<mosaic_0001>
module attributes {stable_mosaic.version = 11 : i64} {
  func.func @_convfcn_kernel(%arg0: i32, %arg1: i32, %arg2: memref<1x32x256xbf16, #tpu.memory_space<vmem>>, %arg3: memref<1x16x256xbf16, #tpu.memory_space<vmem>>, %arg4: memref<64x32xbf16, #tpu.memory_space<vmem>>, %arg5: memref<64x1xf32, #tpu.memory_space<vmem>>, %arg6: memref<64x64xbf16, #tpu.memory_space<vmem>>, %arg7: memref<64x16xbf16, #tpu.memory_space<vmem>>, %arg8: memref<64x1xf32, #tpu.memory_space<vmem>>, %arg9: memref<28x64xbf16, #tpu.memory_space<vmem>>, %arg10: memref<28x1xf32, #tpu.memory_space<vmem>>, %arg11: memref<1x28x256xf32, #tpu.memory_space<vmem>>) attributes {dimension_semantics = [#tpu.dimension_semantics<parallel>, #tpu.dimension_semantics<parallel>], iteration_bounds = array<i64: 2, 1>, scalar_prefetch = 0 : i64, scratch_operands = 0 : i64, tpu.core_type = #tpu.core_type<tc>, window_params = [{transform_indices = @transform_0, window_bounds = array<i64: 1, 32, 256>}, {transform_indices = @transform_1, window_bounds = array<i64: 1, 16, 256>}, {pipeline_mode = #tpu.pipeline_mode<synchronous>, transform_indices = @transform_2, window_bounds = array<i64: 64, 32>}, {pipeline_mode = #tpu.pipeline_mode<synchronous>, transform_indices = @transform_3, window_bounds = array<i64: 64, 1>}, {pipeline_mode = #tpu.pipeline_mode<synchronous>, transform_indices = @transform_4, window_bounds = array<i64: 64, 64>}, {pipeline_mode = #tpu.pipeline_mode<synchronous>, transform_indices = @transform_5, window_bounds = array<i64: 64, 16>}, {pipeline_mode = #tpu.pipeline_mode<synchronous>, transform_indices = @transform_6, window_bounds = array<i64: 64, 1>}, {pipeline_mode = #tpu.pipeline_mode<synchronous>, transform_indices = @transform_7, window_bounds = array<i64: 28, 64>}, {pipeline_mode = #tpu.pipeline_mode<synchronous>, transform_indices = @transform_8, window_bounds = array<i64: 28, 1>}, {transform_indices = @transform_9, window_bounds = array<i64: 1, 28, 256>}]} {
    %c0 = arith.constant 0 : index
    %c0_0 = arith.constant 0 : index
    %c0_1 = arith.constant 0 : index
    %0 = vector.load %arg2[%c0, %c0_0, %c0_1] : memref<1x32x256xbf16, #tpu.memory_space<vmem>>, vector<1x32x256xbf16>
    %1 = vector.shape_cast %0 : vector<1x32x256xbf16> to vector<32x256xbf16>
    %c0_2 = arith.constant 0 : index
    %c0_3 = arith.constant 0 : index
    %c0_4 = arith.constant 0 : index
    %2 = vector.load %arg3[%c0_2, %c0_3, %c0_4] : memref<1x16x256xbf16, #tpu.memory_space<vmem>>, vector<1x16x256xbf16>
    %3 = vector.shape_cast %2 : vector<1x16x256xbf16> to vector<16x256xbf16>
    %c0_5 = arith.constant 0 : index
    %c0_6 = arith.constant 0 : index
    %4 = vector.load %arg4[%c0_5, %c0_6] : memref<64x32xbf16, #tpu.memory_space<vmem>>, vector<64x32xbf16>
    %cst = arith.constant dense<0.000000e+00> : vector<64x256xf32>
    %5 = tpu.matmul %4, %1, %cst {dimension_numbers = #tpu.dot_dimension_numbers<[1], [0], [0], [1], [0, 0, 1, 1], [], []>} : vector<64x32xbf16>, vector<32x256xbf16>, vector<64x256xf32> -> vector<64x256xf32>
    %c0_7 = arith.constant 0 : index
    %c0_8 = arith.constant 0 : index
    %6 = vector.load %arg5[%c0_7, %c0_8] : memref<64x1xf32, #tpu.memory_space<vmem>>, vector<64x1xf32>
    %7 = vector.broadcast %6 : vector<64x1xf32> to vector<64x256xf32>
    %8 = arith.addf %5, %7 : vector<64x256xf32>
    %cst_9 = arith.constant 0.000000e+00 : f32
    %9 = vector.broadcast %cst_9 : f32 to vector<64x256xf32>
    %10 = arith.maximumf %8, %9 : vector<64x256xf32>
    %11 = arith.truncf %10 : vector<64x256xf32> to vector<64x256xbf16>
    %c0_10 = arith.constant 0 : index
    %c0_11 = arith.constant 0 : index
    %12 = vector.load %arg6[%c0_10, %c0_11] : memref<64x64xbf16, #tpu.memory_space<vmem>>, vector<64x64xbf16>
    %cst_12 = arith.constant dense<0.000000e+00> : vector<64x256xf32>
    %13 = tpu.matmul %12, %11, %cst_12 {dimension_numbers = #tpu.dot_dimension_numbers<[1], [0], [0], [1], [0, 0, 1, 1], [], []>} : vector<64x64xbf16>, vector<64x256xbf16>, vector<64x256xf32> -> vector<64x256xf32>
    %c0_13 = arith.constant 0 : index
    %c0_14 = arith.constant 0 : index
    %14 = vector.load %arg7[%c0_13, %c0_14] : memref<64x16xbf16, #tpu.memory_space<vmem>>, vector<64x16xbf16>
    %cst_15 = arith.constant dense<0.000000e+00> : vector<64x256xf32>
    %15 = tpu.matmul %14, %3, %cst_15 {dimension_numbers = #tpu.dot_dimension_numbers<[1], [0], [0], [1], [0, 0, 1, 1], [], []>} : vector<64x16xbf16>, vector<16x256xbf16>, vector<64x256xf32> -> vector<64x256xf32>
    %16 = arith.addf %13, %15 : vector<64x256xf32>
    %c0_16 = arith.constant 0 : index
    %c0_17 = arith.constant 0 : index
    %17 = vector.load %arg8[%c0_16, %c0_17] : memref<64x1xf32, #tpu.memory_space<vmem>>, vector<64x1xf32>
    %18 = vector.broadcast %17 : vector<64x1xf32> to vector<64x256xf32>
    %19 = arith.addf %16, %18 : vector<64x256xf32>
    %cst_18 = arith.constant 0.000000e+00 : f32
    %20 = vector.broadcast %cst_18 : f32 to vector<64x256xf32>
    %21 = arith.maximumf %19, %20 : vector<64x256xf32>
    %22 = arith.truncf %21 : vector<64x256xf32> to vector<64x256xbf16>
    %c0_19 = arith.constant 0 : index
    %c0_20 = arith.constant 0 : index
    %23 = vector.load %arg9[%c0_19, %c0_20] : memref<28x64xbf16, #tpu.memory_space<vmem>>, vector<28x64xbf16>
    %cst_21 = arith.constant dense<0.000000e+00> : vector<28x256xf32>
    %24 = tpu.matmul %23, %22, %cst_21 {dimension_numbers = #tpu.dot_dimension_numbers<[1], [0], [0], [1], [0, 0, 1, 1], [], []>} : vector<28x64xbf16>, vector<64x256xbf16>, vector<28x256xf32> -> vector<28x256xf32>
    %c0_22 = arith.constant 0 : index
    %c0_23 = arith.constant 0 : index
    %25 = vector.load %arg10[%c0_22, %c0_23] : memref<28x1xf32, #tpu.memory_space<vmem>>, vector<28x1xf32>
    %26 = vector.broadcast %25 : vector<28x1xf32> to vector<28x256xf32>
    %27 = arith.addf %24, %26 : vector<28x256xf32>
    %c0_24 = arith.constant 0 : index
    %c0_25 = arith.constant 0 : index
    %c0_26 = arith.constant 0 : index
    %28 = vector.load %arg11[%c0_24, %c0_25, %c0_26] : memref<1x28x256xf32, #tpu.memory_space<vmem>>, vector<1x28x256xf32>
    %29 = vector.shape_cast %28 : vector<1x28x256xf32> to vector<28x256xf32>
    %30 = vector.shape_cast %27 : vector<28x256xf32> to vector<1x28x256xf32>
    tpu.vector_store %arg11[%c0_24, %c0_25, %c0_26], %30 {strides = array<i32>} : memref<1x28x256xf32, #tpu.memory_space<vmem>>, vector<1x28x256xf32>,
    return
  }
  func.func @transform_0(%arg0: i32, %arg1: i32) -> (i32, i32, i32) {
    %c0_i32 = arith.constant 0 : i32
    %c0_i32_0 = arith.constant 0 : i32
    return %arg0, %c0_i32, %arg1 : i32, i32, i32
  }
  func.func @transform_1(%arg0: i32, %arg1: i32) -> (i32, i32, i32) {
    %c0_i32 = arith.constant 0 : i32
    %c0_i32_0 = arith.constant 0 : i32
    return %arg0, %c0_i32, %arg1 : i32, i32, i32
  }
  func.func @transform_2(%arg0: i32, %arg1: i32) -> (i32, i32) {
    %c0_i32 = arith.constant 0 : i32
    %c0_i32_0 = arith.constant 0 : i32
    %c0_i32_1 = arith.constant 0 : i32
    return %c0_i32, %c0_i32_0 : i32, i32
  }
  func.func @transform_3(%arg0: i32, %arg1: i32) -> (i32, i32) {
    %c0_i32 = arith.constant 0 : i32
    %c0_i32_0 = arith.constant 0 : i32
    %c0_i32_1 = arith.constant 0 : i32
    return %c0_i32, %c0_i32_0 : i32, i32
  }
  func.func @transform_4(%arg0: i32, %arg1: i32) -> (i32, i32) {
    %c0_i32 = arith.constant 0 : i32
    %c0_i32_0 = arith.constant 0 : i32
    %c0_i32_1 = arith.constant 0 : i32
    return %c0_i32, %c0_i32_0 : i32, i32
  }
  func.func @transform_5(%arg0: i32, %arg1: i32) -> (i32, i32) {
    %c0_i32 = arith.constant 0 : i32
    %c0_i32_0 = arith.constant 0 : i32
    %c0_i32_1 = arith.constant 0 : i32
    return %c0_i32, %c0_i32_0 : i32, i32
  }
  func.func @transform_6(%arg0: i32, %arg1: i32) -> (i32, i32) {
    %c0_i32 = arith.constant 0 : i32
    %c0_i32_0 = arith.constant 0 : i32
    %c0_i32_1 = arith.constant 0 : i32
    return %c0_i32, %c0_i32_0 : i32, i32
  }
  func.func @transform_7(%arg0: i32, %arg1: i32) -> (i32, i32) {
    %c0_i32 = arith.constant 0 : i32
    %c0_i32_0 = arith.constant 0 : i32
    %c0_i32_1 = arith.constant 0 : i32
    return %c0_i32, %c0_i32_0 : i32, i32
  }
  func.func @transform_8(%arg0: i32, %arg1: i32) -> (i32, i32) {
    %c0_i32 = arith.constant 0 : i32
    %c0_i32_0 = arith.constant 0 : i32
    %c0_i32_1 = arith.constant 0 : i32
    return %c0_i32, %c0_i32_0 : i32, i32
  }
  func.func @transform_9(%arg0: i32, %arg1: i32) -> (i32, i32, i32) {
    %c0_i32 = arith.constant 0 : i32
    %c0_i32_0 = arith.constant 0 : i32
    return %arg0, %c0_i32, %arg1 : i32, i32, i32
  }
}

</mosaic_0001>

<bundles_post_ra>
// kernel: tpu_custom_call.1
= control target key start
LH: loop header
LB: loop body
LE: loop exit
PB: predicated region body
PF: predicated region fallthrough
CT: control target
= control target key end

     0   :  { %s1348_s30 = smov 0   ;;  %s1350_s10 = smov 0   ;;  %s1517_s0 = inlined_call_operand.vmem [shape: bf16[2,32,256], index: 0, kind: input, shape index: {}]   ;;  %s1518_s1 = inlined_call_operand.vmem [shape: bf16[2,16,256], index: 1, kind: input, shape index: {}]   ;;  %s1519_s2 = inlined_call_operand.vmem [shape: bf16[64,32], index: 2, kind: input, shape index: {}]   ;;  %s1520_s3 = inlined_call_operand.vmem [shape: f32[64,1], index: 3, kind: input, shape index: {}]   ;;  %s1521_s4 = inlined_call_operand.vmem [shape: bf16[64,64], index: 4, kind: input, shape index: {}]   ;;  %s1522_s5 = inlined_call_operand.vmem [shape: bf16[64,16], index: 5, kind: input, shape index: {}]   ;;  %s1523_s6 = inlined_call_operand.vmem [shape: f32[64,1], index: 6, kind: input, shape index: {}]   ;;  %s1524_s7 = inlined_call_operand.vmem [shape: bf16[28,64], index: 7, kind: input, shape index: {}]   ;;  %s1525_s8 = inlined_call_operand.vmem [shape: f32[28,1], index: 8, kind: input, shape index: {}]   ;;  %s1526_s9 = inlined_call_operand.vmem [shape: f32[2,28,256], index: 9, kind: output, shape index: {}]  }
   0x1   :  { %s1352_s11 = smov 0  }
   0x2 LB: > { %s31_s12 = sadd.s32 1, %s1291_s10  ;;  %p1161_p0 = scmp.ge.s32.totalorder %s1295_s11, 1  ;;  %s1295_s11 = sphi %s1352_s11, %s19_s11   ;;  %s1291_s10 = sphi %s1350_s10, %s1528_s10   ;;  %s1287_s30 = sphi %s1348_s30, %s1527_s30  }
   0x3   : > { %p33_p1 = scmp.ge.s32.totalorder %s31_s12, 2  ;;  %p325_p2 = scmp.lt.s32.totalorder %s1295_s11, 3 }
   0x5   : > { %s1530_s12 = smov (%p33_p1, %s31_s12), 0  ;;  %p326_p3 = pnand %p1161_p0, %p325_p2 }
   0x6   : > { %p379_p4 = scmp.lt.s32.totalorder (!%p326_p3), %s1287_s30, 1  ;;  %v1297_v0 = vmov (!%p326_p3), 0   ;;  %v423_v1 = vld [vmem:[%s1520_s3] sm:$0xff] (!%p326_p3)  ;;  %v424_v2 = vld [vmem:[%s1520_s3 + $0x8] sm:$0xff] (!%p326_p3)  ;;  %v425_v3 = vld [vmem:[%s1520_s3 + $0x10] sm:$0xff] (!%p326_p3)  ;;  %vm511_vm0 = vcmask (!%p326_p3), 261120  }
   0x7   : > { %329 = sbr.rel (%p326_p3) target bundleno = 750 (0x2ee), region = 56  ;;  %556 = vmatprep.mubr.bf16.mxu0 (!%p326_p3), %v1297_v0  ;;  %1248 = vset.pattern.permute.xlu0 (!%p326_p3), %v1297_v0  ;;  %v426_v4 = vld [vmem:[%s1520_s3 + $0x18] sm:$0xff] (!%p326_p3)  ;;  %v427_v9 = vld [vmem:[%s1520_s3 + $0x20] sm:$0xff] (!%p326_p3)  ;;  %v428_v10 = vld [vmem:[%s1520_s3 + $0x28] sm:$0xff] (!%p326_p3)  ;;  %vm667_vm1 = vcmask (!%p326_p3), 130048   ;;  %vm773_vm2 = vcmask (!%p326_p3), 523264  }
   0x8   : > { %1249 = vset.pattern.permute.xlu1 (!%p326_p3), %v1297_v0  ;;  %712 = vmatprep.mubr.bf16.mxu1 (!%p326_p3), %v1297_v0  ;;  %v1256_v11 = vld [vmem:[%s1519_s2] sm:$0xff] (!%p326_p3)   ;;  %v429_v12 = vld [vmem:[%s1520_s3 + $0x30] sm:$0xff] (!%p326_p3)  ;;  %v430_v13 = vld [vmem:[%s1520_s3 + $0x38] sm:$0xff] (!%p326_p3) }
   0x9   : > { %433 = vperm.xlu0 (!%p326_p3), %1248, %v423_v1   ;;  %443 = vperm.xlu1 (!%p326_p3), %1249, %v425_v3   ;;  %v859_v14 = vld [vmem:[%s1523_s6] sm:$0xff] (!%p326_p3)  ;;  %v860_v15 = vld [vmem:[%s1523_s6 + $0x8] sm:$0xff] (!%p326_p3)  ;;  %v861_v17 = vld [vmem:[%s1523_s6 + $0x10] sm:$0xff] (!%p326_p3) }
   0xa   : > { %v1257_v16 = vld [vmem:[%s1519_s2 + $0x8] sm:$0xff] (!%p326_p3)   ;;  %v862_v18 = vld [vmem:[%s1523_s6 + $0x18] sm:$0xff] (!%p326_p3)  ;;  %v863_v19 = vld [vmem:[%s1523_s6 + $0x20] sm:$0xff] (!%p326_p3) }
   0xb   : > { %v864_v20 = vld [vmem:[%s1523_s6 + $0x28] sm:$0xff] (!%p326_p3)  ;;  %v1258_v21 = vld [vmem:[%s1519_s2 + $0x10] sm:$0xff] (!%p326_p3)   ;;  %v866_v23 = vld [vmem:[%s1523_s6 + $0x38] sm:$0xff] (!%p326_p3) }
   0xc   : > { %v865_v22 = vld [vmem:[%s1523_s6 + $0x30] sm:$0xff] (!%p326_p3)  ;;  %v951_v24 = vld [vmem:[%s1525_s8] sm:$0xff] (!%p326_p3)  ;;  %v952_v25 = vld [vmem:[%s1525_s8 + $0x8] sm:$0xff] (!%p326_p3) }
   0xd   : > { %438 = vperm.xlu0 (!%p326_p3), %1248, %v424_v2   ;;  %448 = vperm.xlu1 (!%p326_p3), %1249, %v426_v4   ;;  %v1259_v26 = vld [vmem:[%s1519_s2 + $0x18] sm:$0xff] (!%p326_p3)   ;;  %v953_v27 = vld [vmem:[%s1525_s8 + $0x10] sm:$0xff] (!%p326_p3)  ;;  %v1263_v31 = vld [vmem:[%s1522_s5] sm:$0xff] (!%p326_p3)  }
   0xe   : > { %s1532_s30 = smov (!%p379_p4, %s1287_s30), 1  ;;  %v954_v28 = vld [vmem:[%s1525_s8 + $0x18] sm:$0xf]  ;;  %v1264_v32 = vld [vmem:[%s1522_s5 + $0x8] sm:$0xff]   ;;  %v1265_v33 = vld [vmem:[%s1522_s5 + $0x10] sm:$0xff]  }
   0xf   : > { %s1204_s13 = sshll.u32 %s1532_s30, 5  ;;  %s1205_s14 = sshll.u32 %s1532_s30, 4  ;;  %v1266_v34 = vld [vmem:[%s1522_s5 + $0x18] sm:$0xff]  }
  0x10   : > { %s386_s18 = scalar_lea.vmem %s1517_s0, %s1204_s13  ;;  %s396_s17 = scalar_lea.vmem %s1518_s1, %s1205_s14 }
  0x11   : > { %v1250_v5 = vld [vmem:[%s386_s18 + $0x4] ss:$8 sps:$4 sm:$0xff]   ;;  %v1252_v6 = vld [vmem:[%s386_s18] ss:$8 sps:$4 sm:$0xff]   ;;  %v1253_v7 = vld [vmem:[%s386_s18 + $0x14] ss:$8 sps:$4 sm:$0xff]   ;;  %453 = vperm.xlu0 %1248, %v427_v9   ;;  %458 = vperm.xlu1 %1249, %v428_v10  }
  0x12   : > { %524 = vmatprep.subr.bf16.mxu0 %v1250_v5  ;;  %v1255_v8 = vld [vmem:[%s386_s18 + $0x10] ss:$8 sps:$4 sm:$0xff]   ;;  %v1260_v29 = vld [vmem:[%s396_s17 + $0x4] ss:$8 sps:$4 sm:$0xff]   ;;  %v1262_v30 = vld [vmem:[%s396_s17] ss:$8 sps:$4 sm:$0xff]  }
  0x13   : > { %525 = vmatpush1.bf16.msra.mxu0 %v1252_v6  ;;  %680 = vmatprep.subr.bf16.mxu1 %v1260_v29  ;;  %s1206_s21 = sshll.u32 %s1532_s30, 6 }
  0x14   : > { %526 = vmatprep.subr.bf16.mxu0 %v1253_v7  ;;  %681 = vmatpush1.bf16.msra.mxu1 %v1262_v30  ;;  %s406_s24 = scalar_lea.vmem %s1526_s9, %s1206_s21 }
  0x15   : > { %463 = vperm.xlu0 %1248, %v429_v12   ;;  %468 = vperm.xlu1 %1249, %v430_v13  }
  0x17   : > { %527 = vmatpush1.bf16.msra.mxu0 %v1255_v8  ;;  %1186 = vmatmul.mubr.msk.bf16.vlgmr.msra.gmra.mrb[0].mxu1 %vm667_vm1, %v1263_v31 }
  0x18   : > { %722 = vmatprep.mubr.bf16.mxu1 %v1297_v0 }
  0x19   : > { %869 = vperm.xlu0 %1248, %v859_v14   ;;  %874 = vperm.xlu1 %1249, %v860_v15  }
  0x1a   : > { %1176 = vmatmul.mubr.msk.bf16.vlgmr.msra.gmra.mrb[0].mxu0 %vm511_vm0, %v1256_v11 }
  0x1b   : > { %566 = vmatprep.mubr.bf16.mxu0 %v1297_v0 }
  0x1d   : > { %879 = vperm.xlu0 %1248, %v861_v17   ;;  %884 = vperm.xlu1 %1249, %v862_v18  }
  0x1f   : > { %1187 = vmatmul.mubr.msk.bf16.gmra.mrb[4].mxu1 %vm667_vm1, %v1264_v32 }
  0x20   : > { %732 = vmatprep.mubr.bf16.mxu1 %v1297_v0 }
  0x21   : > { %889 = vperm.xlu0 %1248, %v863_v19   ;;  %894 = vperm.xlu1 %1249, %v864_v20  }
  0x22   : > { %1177 = vmatmul.mubr.msk.bf16.gmra.mrb[4].mxu0 %vm511_vm0, %v1257_v16 }
  0x23   : > { %576 = vmatprep.mubr.bf16.mxu0 %v1297_v0 }
  0x25   : > { %899 = vperm.xlu0 %1248, %v865_v22   ;;  %904 = vperm.xlu1 %1249, %v866_v23  }
  0x27   : > { %1188 = vmatmul.mubr.msk.bf16.gmra.mrb[8].mxu1 %vm667_vm1, %v1265_v33 }
  0x28   : > { %742 = vmatprep.mubr.bf16.mxu1 %v1297_v0 }
  0x29   : > { %957 = vperm.xlu0 %1248, %v951_v24   ;;  %962 = vperm.xlu1 %1249, %v952_v25  }
  0x2a   : > { %1178 = vmatmul.mubr.msk.bf16.gmra.mrb[8].mxu0 %vm511_vm0, %v1258_v21 }
  0x2b   : > { %586 = vmatprep.mubr.bf16.mxu0 %v1297_v0 }
  0x2d   : > { %967 = vperm.xlu0 %1248, %v953_v27   ;;  %972 = vperm.xlu1 %1249, %v954_v28  }
  0x2f   : > { %1189 = vmatmul.mubr.msk.bf16.gmra.mrb[12].mxu1 %vm667_vm1, %v1266_v34 }
  0x30   : > { %818 = vmatprep.mubr.bf16.mxu1 %v1297_v0 }
  0x32   : > { %1179 = vmatmul.mubr.msk.bf16.gmra.mrb[12].mxu0 %vm511_vm0, %v1259_v26 }
  0x33   : > { %1023 = vmatprep.mubr.bf16.mxu0 %v1297_v0 }
  0x88   : > { %v434_v35 = vpop.permute.xlu0 %433  ;;  %v444_v44 = vpop.permute.xlu1 %443 }
  0x8c   : > { %v439_v39 = vpop.permute.xlu0 %438  ;;  %v449_v55 = vpop.permute.xlu1 %448 }
  0x90   : > { %v454_v3 = vpop.permute.xlu0 %453  ;;  %v459_v8 = vpop.permute.xlu1 %458 }
  0x94   : > { %v464_v19 = vpop.permute.xlu0 %463  ;;  %v469_v24 = vpop.permute.xlu1 %468 }
  0xed   : > { %v558_v36 = vpop.f32.mrb[0].mxu0 }
  0xee   : > { %v559_v37 = vadd.f32 %v558_v36, %v434_v35  ;;  %v560_v38 = vpop.f32.mrb[1].mxu0  ;;  %v1267_v36 = vld [vmem:[%s1521_s4] sm:$0xff]  }
  0xef   : > { %v561_v40 = vadd.f32 %v560_v38, %v434_v35  ;;  %v562_v41 = vpop.f32.mrb[2].mxu0  ;;  %v1269_v38 = vld [vmem:[%s1521_s4 + $0x10] sm:$0xff]  }
  0xf0   : > { %v563_v42 = vadd.f32 %v562_v41, %v439_v39  ;;  %v564_v43 = vpop.f32.mrb[3].mxu0  ;;  %v597_v46 = vmax.f32 %v559_v37, 0.0  ;;  %v1268_v37 = vld [vmem:[%s1521_s4 + $0x8] sm:$0xff]  }
  0xf1   : > { %v565_v45 = vadd.f32 %v564_v43, %v439_v39  ;;  %v598_v48 = vmax.f32 %v561_v40, 0.0  ;;  %v1270_v39 = vld [vmem:[%s1521_s4 + $0x18] sm:$0xff]   ;;  %v870_v40 = vpop.permute.xlu0 %869 }
  0xf2   : > { %v599_v47 = vmax.f32 %v563_v42, 0.0 }
  0xf3   : > { %v600_v49 = vmax.f32 %v565_v45, 0.0 }
  0xf4   : > { %v613_v50 = vpack.c.bf16 %v599_v47, %v597_v46 }
  0xf5   : > { %v614_v51 = vpack.c.bf16 %v600_v49, %v598_v48  ;;  %v568_v52 = vpop.f32.mrb[4].mxu0 }
  0xf6   : > { %v569_v53 = vadd.f32 %v568_v52, %v444_v44  ;;  %v570_v54 = vpop.f32.mrb[5].mxu0 }
  0xf7   : > { %v571_v56 = vadd.f32 %v570_v54, %v444_v44  ;;  %v572_v57 = vpop.f32.mrb[6].mxu0  ;;  %786 = vmatprep.subr.bf16.mxu1 %v614_v51  ;;  %v875_v44 = vpop.permute.xlu1 %874 }
  0xf8   : > { %v573_v58 = vadd.f32 %v572_v57, %v449_v55  ;;  %v574_v59 = vpop.f32.mrb[7].mxu0  ;;  %787 = vmatpush1.bf16.msra.mxu1 %v613_v50  ;;  %v601_v61 = vmax.f32 %v569_v53, 0.0 }
  0xf9   : > { %v575_v60 = vadd.f32 %v574_v59, %v449_v55  ;;  %v602_v63 = vmax.f32 %v571_v56, 0.0  ;;  %v880_v55 = vpop.permute.xlu0 %879 }
  0xfa   : > { %v603_v62 = vmax.f32 %v573_v58, 0.0 }
  0xfb   : > { %v604_v1 = vmax.f32 %v575_v60, 0.0  ;;  %v885_v60 = vpop.permute.xlu1 %884 }
  0xfc   : > { %v615_v2 = vpack.c.bf16 %v603_v62, %v601_v61 }
  0xfd   : > { %v616_v4 = vpack.c.bf16 %v604_v1, %v602_v63  ;;  %v578_v5 = vpop.f32.mrb[8].mxu0 }
  0xfe   : > { %v579_v6 = vadd.f32 %v578_v5, %v454_v3  ;;  %v580_v7 = vpop.f32.mrb[9].mxu0 }
  0xff   : > { %v581_v9 = vadd.f32 %v580_v7, %v454_v3  ;;  %v582_v10 = vpop.f32.mrb[10].mxu0  ;;  %788 = vmatprep.subr.bf16.mxu1 %v616_v4 }
 0x100   : > { %v583_v11 = vadd.f32 %v582_v10, %v459_v8  ;;  %v584_v12 = vpop.f32.mrb[11].mxu0  ;;  %789 = vmatpush1.bf16.msra.mxu1 %v615_v2  ;;  %v605_v14 = vmax.f32 %v579_v6, 0.0 }
 0x101   : > { %v585_v13 = vadd.f32 %v584_v12, %v459_v8  ;;  %v606_v16 = vmax.f32 %v581_v9, 0.0  ;;  %v890_v8 = vpop.permute.xlu0 %889 }
 0x102   : > { %v607_v15 = vmax.f32 %v583_v11, 0.0 }
 0x103   : > { %v608_v17 = vmax.f32 %v585_v13, 0.0  ;;  %v895_v13 = vpop.permute.xlu1 %894 }
 0x104   : > { %v617_v18 = vpack.c.bf16 %v607_v15, %v605_v14 }
 0x105   : > { %v618_v20 = vpack.c.bf16 %v608_v17, %v606_v16  ;;  %v588_v21 = vpop.f32.mrb[12].mxu0 }
 0x106   : > { %v589_v22 = vadd.f32 %v588_v21, %v464_v19  ;;  %v590_v23 = vpop.f32.mrb[13].mxu0 }
 0x107   : > { %v591_v25 = vadd.f32 %v590_v23, %v464_v19  ;;  %v592_v26 = vpop.f32.mrb[14].mxu0  ;;  %790 = vmatprep.subr.bf16.mxu1 %v618_v20 }
 0x108   : > { %v593_v27 = vadd.f32 %v592_v26, %v469_v24  ;;  %v594_v28 = vpop.f32.mrb[15].mxu0  ;;  %791 = vmatpush1.bf16.msra.mxu1 %v617_v18  ;;  %v609_v30 = vmax.f32 %v589_v22, 0.0 }
 0x109   : > { %v595_v29 = vadd.f32 %v594_v28, %v469_v24  ;;  %v610_v32 = vmax.f32 %v591_v25, 0.0  ;;  %v900_v24 = vpop.permute.xlu0 %899 }
 0x10a   : > { %v611_v31 = vmax.f32 %v593_v27, 0.0 }
 0x10b   : > { %v612_v33 = vmax.f32 %v595_v29, 0.0  ;;  %v905_v29 = vpop.permute.xlu1 %904 }
 0x10c   : > { %v619_v34 = vpack.c.bf16 %v611_v31, %v609_v30 }
 0x10d   : > { %v620_v35 = vpack.c.bf16 %v612_v33, %v610_v32 }
 0x10f   : > { %792 = vmatprep.subr.bf16.mxu1 %v620_v35 }
 0x110   : > { %793 = vmatpush1.bf16.msra.mxu1 %v619_v34 }
 0x113   : > { %1194 = vmatmul.mubr.msk.bf16.vlgmr.msra.gmra.mrb[0].mxu1 %vm773_vm2, %v1267_v36 }
 0x114   : > { %828 = vmatprep.mubr.bf16.mxu1 %v1297_v0 }
 0x11b   : > { %1195 = vmatmul.mubr.msk.bf16.gmra.mrb[4].mxu1 %vm773_vm2, %v1268_v37 }
 0x11c   : > { %838 = vmatprep.mubr.bf16.mxu1 %v1297_v0 }
 0x123   : > { %1196 = vmatmul.mubr.msk.bf16.gmra.mrb[8].mxu1 %vm773_vm2, %v1269_v38 }
 0x124   : > { %848 = vmatprep.mubr.bf16.mxu1 %v1297_v0 }
 0x12b   : > { %1197 = vmatmul.mubr.msk.bf16.gmra.mrb[12].mxu1 %vm773_vm2, %v1270_v39 }
 0x1e6   : > { %v820_v41 = vpop.f32.mrb[0].mxu1 }
 0x1e7   : > { %v907_v42 = vadd.f32 %v870_v40, %v820_v41  ;;  %v822_v43 = vpop.f32.mrb[1].mxu1  ;;  %v1271_v41 = vld [vmem:[%s1524_s7] sm:$0xff]  }
 0x1e8   : > { %v908_v45 = vadd.f32 %v870_v40, %v822_v43  ;;  %v824_v46 = vpop.f32.mrb[2].mxu1  ;;  %v958_v43 = vpop.permute.xlu0 %957 }
 0x1e9   : > { %v909_v47 = vadd.f32 %v875_v44, %v824_v46  ;;  %v826_v48 = vpop.f32.mrb[3].mxu1  ;;  %v923_v50 = vmax.f32 %v907_v42, 0.0  ;;  %v1272_v42 = vld [vmem:[%s1524_s7 + $0x8] sm:$0x3f]  }
 0x1ea   : > { %v910_v49 = vadd.f32 %v875_v44, %v826_v48  ;;  %v924_v52 = vmax.f32 %v908_v45, 0.0 }
 0x1eb   : > { %v925_v51 = vmax.f32 %v909_v47, 0.0  ;;  %v963_v47 = vpop.permute.xlu1 %962 }
 0x1ec   : > { %v926_v53 = vmax.f32 %v910_v49, 0.0 }
 0x1ed   : > { %v939_v54 = vpack.c.bf16 %v925_v51, %v923_v50 }
 0x1ee   : > { %v940_v56 = vpack.c.bf16 %v926_v53, %v924_v52  ;;  %v830_v57 = vpop.f32.mrb[4].mxu1  ;;  %v968_v52 = vpop.permute.xlu0 %967 }
 0x1ef   : > { %v911_v58 = vadd.f32 %v880_v55, %v830_v57  ;;  %v832_v59 = vpop.f32.mrb[5].mxu1 }
 0x1f0   : > { %v912_v61 = vadd.f32 %v880_v55, %v832_v59  ;;  %v834_v62 = vpop.f32.mrb[6].mxu1  ;;  %991 = vmatprep.subr.bf16.mxu0 %v940_v56  ;;  %v973_v56 = vpop.permute.xlu1 %972 }
 0x1f1   : > { %v913_v63 = vadd.f32 %v885_v60, %v834_v62  ;;  %v836_v1 = vpop.f32.mrb[7].mxu1  ;;  %992 = vmatpush1.bf16.msra.mxu0 %v939_v54  ;;  %v927_v3 = vmax.f32 %v911_v58, 0.0 }
 0x1f2   : > { %v914_v2 = vadd.f32 %v885_v60, %v836_v1  ;;  %v928_v5 = vmax.f32 %v912_v61, 0.0 }
 0x1f3   : > { %v929_v4 = vmax.f32 %v913_v63, 0.0 }
 0x1f4   : > { %v930_v6 = vmax.f32 %v914_v2, 0.0 }
 0x1f5   : > { %v941_v7 = vpack.c.bf16 %v929_v4, %v927_v3 }
 0x1f6   : > { %v942_v9 = vpack.c.bf16 %v930_v6, %v928_v5  ;;  %v840_v10 = vpop.f32.mrb[8].mxu1 }
 0x1f7   : > { %v915_v11 = vadd.f32 %v890_v8, %v840_v10  ;;  %v842_v12 = vpop.f32.mrb[9].mxu1 }
 0x1f8   : > { %v916_v14 = vadd.f32 %v890_v8, %v842_v12  ;;  %v844_v15 = vpop.f32.mrb[10].mxu1  ;;  %993 = vmatprep.subr.bf16.mxu0 %v942_v9 }
 0x1f9   : > { %v917_v16 = vadd.f32 %v895_v13, %v844_v15  ;;  %v846_v17 = vpop.f32.mrb[11].mxu1  ;;  %994 = vmatpush1.bf16.msra.mxu0 %v941_v7  ;;  %v931_v19 = vmax.f32 %v915_v11, 0.0 }
 0x1fa   : > { %v918_v18 = vadd.f32 %v895_v13, %v846_v17  ;;  %v932_v21 = vmax.f32 %v916_v14, 0.0 }
 0x1fb   : > { %v933_v20 = vmax.f32 %v917_v16, 0.0 }
 0x1fc   : > { %v934_v22 = vmax.f32 %v918_v18, 0.0 }
 0x1fd   : > { %v943_v23 = vpack.c.bf16 %v933_v20, %v931_v19 }
 0x1fe   : > { %v944_v25 = vpack.c.bf16 %v934_v22, %v932_v21  ;;  %v850_v26 = vpop.f32.mrb[12].mxu1 }
 0x1ff   : > { %v919_v27 = vadd.f32 %v900_v24, %v850_v26  ;;  %v852_v28 = vpop.f32.mrb[13].mxu1 }
 0x200   : > { %v920_v30 = vadd.f32 %v900_v24, %v852_v28  ;;  %v854_v31 = vpop.f32.mrb[14].mxu1  ;;  %995 = vmatprep.subr.bf16.mxu0 %v944_v25 }
 0x201   : > { %v921_v32 = vadd.f32 %v905_v29, %v854_v31  ;;  %v856_v33 = vpop.f32.mrb[15].mxu1  ;;  %996 = vmatpush1.bf16.msra.mxu0 %v943_v23  ;;  %v935_v35 = vmax.f32 %v919_v27, 0.0 }
 0x202   : > { %v922_v34 = vadd.f32 %v905_v29, %v856_v33  ;;  %v936_v37 = vmax.f32 %v920_v30, 0.0 }
 0x203   : > { %v937_v36 = vmax.f32 %v921_v32, 0.0 }
 0x204   : > { %v938_v38 = vmax.f32 %v922_v34, 0.0 }
 0x205   : > { %v945_v39 = vpack.c.bf16 %v937_v36, %v935_v35 }
 0x206   : > { %v946_v40 = vpack.c.bf16 %v938_v38, %v936_v37 }
 0x208   : > { %997 = vmatprep.subr.bf16.mxu0 %v946_v40 }
 0x209   : > { %998 = vmatpush1.bf16.msra.mxu0 %v945_v39 }
 0x20c   : > { %1200 = vmatmul.mubr.msk.bf16.vlgmr.msra.gmra.mrb[16].mxu0 %vm773_vm2, %v1271_v41 }
 0x20d   : > { %1033 = vmatprep.mubr.bf16.mxu0 %v1297_v0 }
 0x214   : > { %1201 = vmatmul.mubr.msk.bf16.gmra.mrb[20].mxu0 %vm773_vm2, %v1272_v42 }
 0x2df   : > { %v1025_v44 = vpop.f32.mrb[16].mxu0 }
 0x2e0   : > { %v1026_v45 = vadd.f32 %v1025_v44, %v958_v43  ;;  %v1027_v46 = vpop.f32.mrb[17].mxu0 }
 0x2e1   : > { %v1028_v48 = vadd.f32 %v1027_v46, %v958_v43  ;;  %v1029_v49 = vpop.f32.mrb[18].mxu0 }
 0x2e2   : > { %1044 = vst [vmem:[%s406_s24] sm:$0xff] %v1026_v45  ;;  %v1030_v0 = vadd.f32 %v1029_v49, %v963_v47  ;;  %v1031_v50 = vpop.f32.mrb[19].mxu0 }
 0x2e3   : > { %1045 = vst [vmem:[%s406_s24 + $0x8] sm:$0xff] %v1028_v48  ;;  %v1032_v51 = vadd.f32 %v1031_v50, %v963_v47 }
 0x2e4   : > { %1046 = vst [vmem:[%s406_s24 + $0x10] sm:$0xff] %v1030_v0 }
 0x2e5   : > { %1047 = vst [vmem:[%s406_s24 + $0x18] sm:$0xff] %v1032_v51 }
 0x2e7   : > { %v1035_v53 = vpop.f32.mrb[20].mxu0 }
 0x2e8   : > { %v1036_v54 = vadd.f32 %v1035_v53, %v968_v52  ;;  %v1037_v55 = vpop.f32.mrb[21].mxu0 }
 0x2e9   : > { %v1038_v57 = vadd.f32 %v1037_v55, %v968_v52  ;;  %v1039_v58 = vpop.f32.mrb[22].mxu0 }
 0x2ea   : > { %1048 = vst [vmem:[%s406_s24 + $0x20] sm:$0xff] %v1036_v54  ;;  %v1040_v59 = vadd.f32 %v1039_v58, %v973_v56  ;;  %v1041_v60 = vpop.f32.mrb[23].mxu0 }
 0x2eb   : > { %1049 = vst [vmem:[%s406_s24 + $0x28] sm:$0xff] %v1038_v57  ;;  %v1042_v61 = vadd.f32 %v1041_v60, %v973_v56 }
 0x2ec   : > { %1050 = vst [vmem:[%s406_s24 + $0x30] sm:$0xf] %v1040_v59 }
 0x2ed   : > { %1051 = vst [vmem:[%s406_s24 + $0x38] sm:$0xf] %v1042_v61 }
 0x2ee PF: > { %s19_s11 = sadd.s32 1, %s1295_s11   ;;  %s1527_s30 = smov %s1291_s10 }
 0x2ef   : > { %p16_p5 = scmp.ge.s32.totalorder %s19_s11, 4   ;;  %s1528_s10 = smov %s1530_s12 }
 0x2f1   :  { %18 = sbr.rel (!%p16_p5) target bundleno = 2 (0x2), region = 89 }

</bundles_post_ra>
